<compile_context>
chip_gen: v7x
topology: tpu7x:2x2x1
jax: 0.10.0
libtpu: 0.0.40
codegen_flags: <defaults>
</compile_context>

<pallas_src>
import functools

import jax
import jax.numpy as jnp
from jax.experimental import pallas as pl
from jax.experimental.pallas import tpu as pltpu


# ----------------------------- Pallas kernel --------------------------------
def mean_field_kernel(u_ref, mew_ref, lc_ref, out_ref, *,
                      n_dirs, max_iter, n_classes_padded, batch_tile, W):
    """One batch-tile per grid step, batch folded onto the sublane axis.

    u_ref   : (Bt*Cp, HW)        negative-log unary costs (row index = b*Cp + c)
    mew_ref : (Bt, n_dirs, HW)   compact edge weights (masks & 1/n_dirs folded)
    lc_ref  : (Cp, Cp)           (padded) label-context matrix
    out_ref : (Bt*Cp, HW)        final cost (= -q_i)
    """
    Cp, Bt = n_classes_padded, batch_tile
    neg_u = -u_ref[...]                                  # (BtC, HW)
    BtC, HW = neg_u.shape

    # ---- loop-invariant setup (hoisted out of the iteration loop) -----------
    # class-broadcast of the compact per-batch edge weights -> (BtC, HW) per dir
    mew_d = []
    for d in range(n_dirs):
        per_b = [jnp.broadcast_to(mew_ref[b, d:d + 1, :], (Cp, HW))
                 for b in range(Bt)]
        mew_d.append(per_b[0] if Bt == 1 else jnp.concatenate(per_b, axis=0))

    # block-diagonal label context & block-ones (per-block sum operand), once.
    lc = lc_ref[...]                                     # (Cp, Cp)

    def _block_diag(blk):
        if Bt == 1:
            return blk
        z = jnp.zeros_like(blk)
        return jnp.concatenate(
            [jnp.concatenate([blk if j == b else z for j in range(Bt)], axis=1)
             for b in range(Bt)], axis=0)

    lcb = _block_diag(lc)                                # (BtC, BtC)
    blk_ones = _block_diag(jnp.ones_like(lc))            # (BtC, BtC)

    # butterfly masks for the per-block max: (BtC, 1) columns (lane-broadcast)
    row = jax.lax.broadcasted_iota(jnp.int32, (BtC, 1), 0)
    dists = []
    d = 1
    while d < Cp:                                        # 1, 2, ..., Cp/2
        dists.append(d)
        d *= 2
    bf_masks = [(row % (2 * dd)) < dd for dd in dists]

    def block_max(x):
        # All-reduce max over each aligned block of Cp rows via an XOR
        # butterfly of sublane rolls; partners never leave their block.
        for dd, m in zip(dists, bf_masks):
            up = pltpu.roll(x, BtC - dd, axis=0)         # x[r + dd]
            dn = pltpu.roll(x, dd, axis=0)               # x[r - dd]
            x = jnp.maximum(x, jnp.where(m, up, dn))
        return x

    def softmax_block(x):
        m = block_max(x)
        e = jnp.exp(x - m)
        # per-block sum on the MXU (block-ones matmul) -> frees the XLU slots
        s = jnp.dot(blk_ones, e, preferred_element_type=jnp.float32,
                    precision=jax.lax.Precision.HIGHEST)
        inv = pl.reciprocal(s, approx=True)              # EUP slot
        inv = inv * (2.0 - s * inv)                      # one Newton step
        return e * inv

    def shifted(q, dd):
        # One-pixel shift over the flattened HW (lane) axis; wrapped border
        # lanes are zeroed by the masks already folded into the edge weights.
        if dd == 0:    # neighbor from the left : q[h, w-1]
            return pltpu.roll(q, 1, axis=1)
        elif dd == 1:  # neighbor from the right: q[h, w+1]
            return pltpu.roll(q, HW - 1, axis=1)
        elif dd == 2:  # neighbor from above    : q[h-1, w]
            return pltpu.roll(q, W, axis=1)
        else:          # neighbor from below    : q[h+1, w]
            return pltpu.roll(q, HW - W, axis=1)

    def message_pass(q):
        # weighted mean of shifted beliefs (masks & 1/n_dirs folded into mew)
        q_tild = mew_d[0] * shifted(q, 0)
        for dd in range(1, n_dirs):
            q_tild = q_tild + mew_d[dd] * shifted(q, dd)
        # label-context mixing: a single block-diagonal MXU matmul
        q_hat = jnp.dot(lcb, q_tild, preferred_element_type=jnp.float32,
                        precision=jax.lax.Precision.HIGHEST)
        return neg_u - q_hat

    # ---- mean-field iterations ----------------------------------------------
    q = softmax_block(neg_u)
    if max_iter >= 1:
        n_soft = max_iter - 1                            # iterations ending in softmax
        if n_soft > 0:
            if n_soft <= 8:                              # short: static unroll
                for _ in range(n_soft):
                    q = softmax_block(message_pass(q))
            else:                                        # long: bound live ranges
                q = jax.lax.fori_loop(
                    0, n_soft, lambda it, qq: softmax_block(message_pass(qq)), q)
        q = message_pass(q)                              # last iteration: no softmax
    out_ref[...] = -q


# ------------------------------- wrapper -------------------------------------
def _next_pow2(n):
    p = 1
    while p < n:
        p *= 2
    return p


def _pick_batch_tile(B, Cp):
    # smallest batch tile whose folded row count fills the 8-row f32 sublane
    # tile (full vregs while maximizing grid steps for v7x TC sharding).
    # TODO(synk): for very small B on v7x, fold H rows onto sublanes instead so
    # the parallel grid still has >= 2 steps.
    for bt in range(1, B + 1):
        if B % bt == 0 and (bt * Cp) % 8 == 0:
            return bt
    return B    # single block over the whole batch (block == full array is legal)


def mean_field_forward(unary, edge_weights, label_context, *, n_dirs, max_iter):
    """unary: (B,1,C,H,W)  edge_weights: (B,n_dirs,H,W)  label_context: (C,C)
    returns final_cost: (B,1,C,H,W)"""
    B, one, C, H, W = unary.shape
    assert one == 1 and 1 <= n_dirs <= 4
    HW = H * W
    Cp = _next_pow2(C)            # pad classes so the butterfly works for any C
    Bt = _pick_batch_tile(B, Cp)
    BtC = Bt * Cp

    # unary: pad extra classes with a huge cost (softmax weight ~0), flatten HW.
    u = unary.reshape(B, C, HW).astype(jnp.float32)
    if Cp != C:
        u = jnp.concatenate(
            [u, jnp.full((B, Cp - C, HW), 1e9, dtype=jnp.float32)], axis=1)
    u2 = u.reshape(B * Cp, HW)

    # compact edge weights: fold border masks and the 1/n_dirs mean factor once;
    # the class broadcast happens inside the kernel (no C-fold HBM inflation).
    w_idx = jnp.arange(HW, dtype=jnp.int32) % W
    h_idx = jnp.arange(HW, dtype=jnp.int32) // W
    masks = jnp.stack([w_idx != 0, w_idx != W - 1, h_idx != 0, h_idx != H - 1],
                      axis=0)[:n_dirs].astype(jnp.float32)        # (n_dirs, HW)
    mew = edge_weights.reshape(B, n_dirs, HW).astype(jnp.float32)
    mew = mew * masks[None] * (1.0 / n_dirs)                      # (B, n_dirs, HW)

    # raw label context, zero-padded so padded classes never mix into real ones.
    lc = label_context.astype(jnp.float32)
    if Cp != C:
        lc = jnp.pad(lc, ((0, Cp - C), (0, Cp - C)))

    # TODO(synk): for production-sized images add an HW-tile grid axis with a
    # max_iter-wide halo (and lay H on sublanes / W on 128-aligned lanes) so
    # blocks fit v7x's 64 MiB VMEM and vertical shifts become whole-vreg moves.

    # VMEM budget derived from actual block sizes (double-buffered), clamped.
    block_bytes = 4 * (2 * BtC * HW + Bt * n_dirs * HW + Cp * Cp)
    vmem_limit = min(max(2 * block_bytes + (8 << 20), 32 << 20), 100 << 20)
    try:
        vmem_limit = min(vmem_limit,
                         (pltpu.get_tpu_info().vmem_capacity_bytes * 3) // 4)
    except Exception:
        pass

    out = pl.pallas_call(
        functools.partial(mean_field_kernel, n_dirs=n_dirs, max_iter=max_iter,
                          n_classes_padded=Cp, batch_tile=Bt, W=W),
        out_shape=jax.ShapeDtypeStruct((B * Cp, HW), jnp.float32),
        grid=(B // Bt,),
        in_specs=[
            pl.BlockSpec((BtC, HW), lambda i: (i, 0)),
            pl.BlockSpec((Bt, n_dirs, HW), lambda i: (i, 0, 0)),
            pl.BlockSpec((Cp, Cp), lambda i: (0, 0)),
        ],
        out_specs=pl.BlockSpec((BtC, HW), lambda i: (i, 0)),
        compiler_params=pltpu.CompilerParams(
            dimension_semantics=("parallel",),
            vmem_limit_bytes=int(vmem_limit)),
    )(u2, mew, lc)

    out = out.reshape(B, Cp, H, W)[:, :C]
    return out[:, None]


# -------------------------- pure-JAX reference --------------------------------
def _get_edge_shift_ref(q, n_dirs):
    # q: (B, C, H, W) -> (n_dirs, B, C, H, W); zero-padded 1-pixel shifts.
    outs = [
        jnp.roll(q, 1, axis=3).at[:, :, :, 0].set(0.0),
        jnp.roll(q, -1, axis=3).at[:, :, :, -1].set(0.0),
        jnp.roll(q, 1, axis=2).at[:, :, 0, :].set(0.0),
        jnp.roll(q, -1, axis=2).at[:, :, -1, :].set(0.0),
    ]
    return jnp.stack(outs[:n_dirs], axis=0)


def mean_field_ref(unary, edge_weights, label_context, *, n_dirs, max_iter):
    u = unary[:, 0]                                           # (B, C, H, W)
    q = jax.nn.softmax(-u, axis=1)
    ew = jnp.transpose(edge_weights, (1, 0, 2, 3))[:, :, None]  # (n_dirs,B,1,H,W)
    for it in range(max_iter):
        q_j = _get_edge_shift_ref(q, n_dirs)                  # (n_dirs,B,C,H,W)
        q_tild = jnp.mean(ew * q_j, axis=0)                   # (B, C, H, W)
        q_hat = jnp.einsum("lc,bchw->blhw", label_context, q_tild)
        q = -u - q_hat
        if it < max_iter - 1:
            q = jax.nn.softmax(q, axis=1)
    return (-q)[:, None]                                      # (B,1,C,H,W)


# --------------------------------- main ---------------------------------------
if __name__ == "__main__":
    B, C, H, W = 2, 4, 16, 16
    n_dirs, max_iter = 4, 3

    key = jax.random.PRNGKey(0)
    k1, k2, k3 = jax.random.split(key, 3)
    unary = jax.random.normal(k1, (B, 1, C, H, W), dtype=jnp.float32)
    edge_weights = jax.nn.sigmoid(
        jax.random.normal(k2, (B, n_dirs, H, W), dtype=jnp.float32))
    # deterministic stand-in for create_label_context: small random (C,C) matrix
    label_context = 0.1 * jax.random.normal(k3, (C, C), dtype=jnp.float32)

    final_cost = mean_field_forward(
        unary, edge_weights, label_context, n_dirs=n_dirs, max_iter=max_iter)
    final_cost = jax.block_until_ready(final_cost)

    ref = mean_field_ref(
        unary, edge_weights, label_context, n_dirs=n_dirs, max_iter=max_iter)
    assert final_cost.shape == (B, 1, C, H, W)
    assert jnp.allclose(final_cost, ref, atol=1e-4, rtol=1e-4), (
        float(jnp.max(jnp.abs(final_cost - ref))))

    print("KERNEL_OK")
</pallas_src>

<mosaic_0001>
module attributes {stable_mosaic.version = 11 : i64} {
  func.func @mean_field_kernel(%arg0: i32, %arg1: memref<8x256xf32, #tpu.memory_space<vmem>>, %arg2: memref<2x4x256xf32, #tpu.memory_space<vmem>>, %arg3: memref<4x4xf32, #tpu.memory_space<vmem>>, %arg4: memref<8x256xf32, #tpu.memory_space<vmem>>) attributes {dimension_semantics = [#tpu.dimension_semantics<parallel>], iteration_bounds = array<i64: 1>, scalar_prefetch = 0 : i64, scratch_operands = 0 : i64, tpu.core_type = #tpu.core_type<tc>, window_params = [{transform_indices = @transform_0, window_bounds = array<i64: 8, 256>}, {transform_indices = @transform_1, window_bounds = array<i64: 2, 4, 256>}, {pipeline_mode = #tpu.pipeline_mode<synchronous>, transform_indices = @transform_2, window_bounds = array<i64: 4, 4>}, {transform_indices = @transform_3, window_bounds = array<i64: 8, 256>}]} {
    %c0 = arith.constant 0 : index
    %c0_0 = arith.constant 0 : index
    %0 = vector.load %arg1[%c0, %c0_0] : memref<8x256xf32, #tpu.memory_space<vmem>>, vector<8x256xf32>
    %cst = arith.constant 0.000000e+00 : f32
    %1 = vector.broadcast %cst : f32 to vector<8x256xf32>
    %2 = arith.subf %1, %0 : vector<8x256xf32>
    %c0_1 = arith.constant 0 : index
    %c0_2 = arith.constant 0 : index
    %c0_3 = arith.constant 0 : index
    %3 = vector.load %arg2[%c0_1, %c0_2, %c0_3] : memref<2x4x256xf32, #tpu.memory_space<vmem>>, vector<1x1x256xf32>
    %4 = vector.shape_cast %3 : vector<1x1x256xf32> to vector<1x256xf32>
    %5 = vector.shape_cast %4 : vector<1x256xf32> to vector<1x256xf32>
    %6 = vector.broadcast %5 : vector<1x256xf32> to vector<4x256xf32>
    %c1 = arith.constant 1 : index
    %c0_4 = arith.constant 0 : index
    %c0_5 = arith.constant 0 : index
    %7 = vector.load %arg2[%c1, %c0_4, %c0_5] : memref<2x4x256xf32, #tpu.memory_space<vmem>>, vector<1x1x256xf32>
    %8 = vector.shape_cast %7 : vector<1x1x256xf32> to vector<1x256xf32>
    %9 = vector.shape_cast %8 : vector<1x256xf32> to vector<1x256xf32>
    %10 = vector.broadcast %9 : vector<1x256xf32> to vector<4x256xf32>
    %11 = tpu.concatenate %6, %10 in 0 : vector<4x256xf32>, vector<4x256xf32> -> vector<8x256xf32>
    %c0_6 = arith.constant 0 : index
    %c1_7 = arith.constant 1 : index
    %c0_8 = arith.constant 0 : index
    %12 = vector.load %arg2[%c0_6, %c1_7, %c0_8] : memref<2x4x256xf32, #tpu.memory_space<vmem>>, vector<1x1x256xf32>
    %13 = vector.shape_cast %12 : vector<1x1x256xf32> to vector<1x256xf32>
    %14 = vector.shape_cast %13 : vector<1x256xf32> to vector<1x256xf32>
    %15 = vector.broadcast %14 : vector<1x256xf32> to vector<4x256xf32>
    %c1_9 = arith.constant 1 : index
    %c1_10 = arith.constant 1 : index
    %c0_11 = arith.constant 0 : index
    %16 = vector.load %arg2[%c1_9, %c1_10, %c0_11] : memref<2x4x256xf32, #tpu.memory_space<vmem>>, vector<1x1x256xf32>
    %17 = vector.shape_cast %16 : vector<1x1x256xf32> to vector<1x256xf32>
    %18 = vector.shape_cast %17 : vector<1x256xf32> to vector<1x256xf32>
    %19 = vector.broadcast %18 : vector<1x256xf32> to vector<4x256xf32>
    %20 = tpu.concatenate %15, %19 in 0 : vector<4x256xf32>, vector<4x256xf32> -> vector<8x256xf32>
    %c0_12 = arith.constant 0 : index
    %c2 = arith.constant 2 : index
    %c0_13 = arith.constant 0 : index
    %21 = vector.load %arg2[%c0_12, %c2, %c0_13] : memref<2x4x256xf32, #tpu.memory_space<vmem>>, vector<1x1x256xf32>
    %22 = vector.shape_cast %21 : vector<1x1x256xf32> to vector<1x256xf32>
    %23 = vector.shape_cast %22 : vector<1x256xf32> to vector<1x256xf32>
    %24 = vector.broadcast %23 : vector<1x256xf32> to vector<4x256xf32>
    %c1_14 = arith.constant 1 : index
    %c2_15 = arith.constant 2 : index
    %c0_16 = arith.constant 0 : index
    %25 = vector.load %arg2[%c1_14, %c2_15, %c0_16] : memref<2x4x256xf32, #tpu.memory_space<vmem>>, vector<1x1x256xf32>
    %26 = vector.shape_cast %25 : vector<1x1x256xf32> to vector<1x256xf32>
    %27 = vector.shape_cast %26 : vector<1x256xf32> to vector<1x256xf32>
    %28 = vector.broadcast %27 : vector<1x256xf32> to vector<4x256xf32>
    %29 = tpu.concatenate %24, %28 in 0 : vector<4x256xf32>, vector<4x256xf32> -> vector<8x256xf32>
    %c0_17 = arith.constant 0 : index
    %c3 = arith.constant 3 : index
    %c0_18 = arith.constant 0 : index
    %30 = vector.load %arg2[%c0_17, %c3, %c0_18] : memref<2x4x256xf32, #tpu.memory_space<vmem>>, vector<1x1x256xf32>
    %31 = vector.shape_cast %30 : vector<1x1x256xf32> to vector<1x256xf32>
    %32 = vector.shape_cast %31 : vector<1x256xf32> to vector<1x256xf32>
    %33 = vector.broadcast %32 : vector<1x256xf32> to vector<4x256xf32>
    %c1_19 = arith.constant 1 : index
    %c3_20 = arith.constant 3 : index
    %c0_21 = arith.constant 0 : index
    %34 = vector.load %arg2[%c1_19, %c3_20, %c0_21] : memref<2x4x256xf32, #tpu.memory_space<vmem>>, vector<1x1x256xf32>
    %35 = vector.shape_cast %34 : vector<1x1x256xf32> to vector<1x256xf32>
    %36 = vector.shape_cast %35 : vector<1x256xf32> to vector<1x256xf32>
    %37 = vector.broadcast %36 : vector<1x256xf32> to vector<4x256xf32>
    %38 = tpu.concatenate %33, %37 in 0 : vector<4x256xf32>, vector<4x256xf32> -> vector<8x256xf32>
    %c0_22 = arith.constant 0 : index
    %c0_23 = arith.constant 0 : index
    %39 = vector.load %arg3[%c0_22, %c0_23] : memref<4x4xf32, #tpu.memory_space<vmem>>, vector<4x4xf32>
    %cst_24 = arith.constant 0.000000e+00 : f32
    %40 = vector.broadcast %cst_24 : f32 to vector<4x4xf32>
    %41 = tpu.concatenate %39, %40 in 1 : vector<4x4xf32>, vector<4x4xf32> -> vector<4x8xf32>
    %42 = tpu.concatenate %40, %39 in 1 : vector<4x4xf32>, vector<4x4xf32> -> vector<4x8xf32>
    %43 = tpu.concatenate %41, %42 in 0 : vector<4x8xf32>, vector<4x8xf32> -> vector<8x8xf32>
    %cst_25 = arith.constant 1.000000e+00 : f32
    %44 = vector.broadcast %cst_25 : f32 to vector<4x4xf32>
    %cst_26 = arith.constant 0.000000e+00 : f32
    %45 = vector.broadcast %cst_26 : f32 to vector<4x4xf32>
    %46 = tpu.concatenate %44, %45 in 1 : vector<4x4xf32>, vector<4x4xf32> -> vector<4x8xf32>
    %47 = tpu.concatenate %45, %44 in 1 : vector<4x4xf32>, vector<4x4xf32> -> vector<4x8xf32>
    %48 = tpu.concatenate %46, %47 in 0 : vector<4x8xf32>, vector<4x8xf32> -> vector<8x8xf32>
    %49 = tpu.iota {dimensions = array<i32: 0>} : vector<8x1xi32>
    %c2_i32 = arith.constant 2 : i32
    %c0_i32 = arith.constant 0 : i32
    %50 = arith.cmpi eq, %c2_i32, %c0_i32 : i32
    %c1_i32 = arith.constant 1 : i32
    %51 = arith.select %50, %c1_i32, %c2_i32 : i32
    %52 = vector.broadcast %51 : i32 to vector<8x1xi32>
    %53 = arith.remsi %49, %52 : vector<8x1xi32>
    %c0_i32_27 = arith.constant 0 : i32
    %54 = vector.broadcast %c0_i32_27 : i32 to vector<8x1xi32>
    %55 = arith.cmpi ne, %53, %54 : vector<8x1xi32>
    %c0_i32_28 = arith.constant 0 : i32
    %56 = vector.broadcast %c0_i32_28 : i32 to vector<8x1xi32>
    %57 = arith.cmpi slt, %53, %56 : vector<8x1xi32>
    %c0_i32_29 = arith.constant 0 : i32
    %58 = arith.cmpi slt, %51, %c0_i32_29 : i32
    %59 = vector.broadcast %58 : i1 to vector<8x1xi1>
    %60 = vector.broadcast %59 : vector<8x1xi1> to vector<8x1xi1>
    %61 = arith.xori %57, %60 : vector<8x1xi1>
    %62 = arith.andi %61, %55 : vector<8x1xi1>
    %63 = vector.broadcast %51 : i32 to vector<8x1xi32>
    %64 = arith.addi %53, %63 : vector<8x1xi32>
    %65 = arith.select %62, %64, %53 : vector<8x1xi1>, vector<8x1xi32>
    %c1_i32_30 = arith.constant 1 : i32
    %66 = vector.broadcast %c1_i32_30 : i32 to vector<8x1xi32>
    %67 = arith.cmpi slt, %65, %66 : vector<8x1xi32>
    %c4_i32 = arith.constant 4 : i32
    %c0_i32_31 = arith.constant 0 : i32
    %68 = arith.cmpi eq, %c4_i32, %c0_i32_31 : i32
    %c1_i32_32 = arith.constant 1 : i32
    %69 = arith.select %68, %c1_i32_32, %c4_i32 : i32
    %70 = vector.broadcast %69 : i32 to vector<8x1xi32>
    %71 = arith.remsi %49, %70 : vector<8x1xi32>
    %c0_i32_33 = arith.constant 0 : i32
    %72 = vector.broadcast %c0_i32_33 : i32 to vector<8x1xi32>
    %73 = arith.cmpi ne, %71, %72 : vector<8x1xi32>
    %c0_i32_34 = arith.constant 0 : i32
    %74 = vector.broadcast %c0_i32_34 : i32 to vector<8x1xi32>
    %75 = arith.cmpi slt, %71, %74 : vector<8x1xi32>
    %c0_i32_35 = arith.constant 0 : i32
    %76 = arith.cmpi slt, %69, %c0_i32_35 : i32
    %77 = vector.broadcast %76 : i1 to vector<8x1xi1>
    %78 = vector.broadcast %77 : vector<8x1xi1> to vector<8x1xi1>
    %79 = arith.xori %75, %78 : vector<8x1xi1>
    %80 = arith.andi %79, %73 : vector<8x1xi1>
    %81 = vector.broadcast %69 : i32 to vector<8x1xi32>
    %82 = arith.addi %71, %81 : vector<8x1xi32>
    %83 = arith.select %80, %82, %71 : vector<8x1xi1>, vector<8x1xi32>
    %c2_i32_36 = arith.constant 2 : i32
    %84 = vector.broadcast %c2_i32_36 : i32 to vector<8x1xi32>
    %85 = arith.cmpi slt, %83, %84 : vector<8x1xi32>
    %c7_i32 = arith.constant 7 : i32
    %86 = tpu.dynamic_rotate %2 by %c7_i32 dim 0 : vector<8x256xf32>, i32 -> vector<8x256xf32>
    %c1_i32_37 = arith.constant 1 : i32
    %87 = tpu.dynamic_rotate %2 by %c1_i32_37 dim 0 : vector<8x256xf32>, i32 -> vector<8x256xf32>
    %88 = vector.shape_cast %67 : vector<8x1xi1> to vector<8x1xi1>
    %89 = vector.broadcast %88 : vector<8x1xi1> to vector<8x256xi1>
    %90 = arith.select %89, %86, %87 : vector<8x256xi1>, vector<8x256xf32>
    %91 = arith.maximumf %2, %90 : vector<8x256xf32>
    %c6_i32 = arith.constant 6 : i32
    %92 = tpu.dynamic_rotate %91 by %c6_i32 dim 0 : vector<8x256xf32>, i32 -> vector<8x256xf32>
    %c2_i32_38 = arith.constant 2 : i32
    %93 = tpu.dynamic_rotate %91 by %c2_i32_38 dim 0 : vector<8x256xf32>, i32 -> vector<8x256xf32>
    %94 = vector.shape_cast %85 : vector<8x1xi1> to vector<8x1xi1>
    %95 = vector.broadcast %94 : vector<8x1xi1> to vector<8x256xi1>
    %96 = arith.select %95, %92, %93 : vector<8x256xi1>, vector<8x256xf32>
    %97 = arith.maximumf %91, %96 : vector<8x256xf32>
    %98 = arith.subf %2, %97 : vector<8x256xf32>
    %99 = math.exp %98 : vector<8x256xf32>
    %cst_39 = arith.constant dense<0.000000e+00> : vector<8x256xf32>
    %100 = tpu.matmul %48, %99, %cst_39 {dimension_numbers = #tpu.dot_dimension_numbers<[1], [0], [0], [1], [0, 0, 1, 1], [], []>, precision = #tpu.contract_precision<fp32>} : vector<8x8xf32>, vector<8x256xf32>, vector<8x256xf32> -> vector<8x256xf32>
    %101 = tpu.reciprocal %100 {approx = true} : vector<8x256xf32> -> vector<8x256xf32>
    %102 = arith.mulf %100, %101 : vector<8x256xf32>
    %cst_40 = arith.constant 2.000000e+00 : f32
    %103 = vector.broadcast %cst_40 : f32 to vector<8x256xf32>
    %104 = arith.subf %103, %102 : vector<8x256xf32>
    %105 = arith.mulf %101, %104 : vector<8x256xf32>
    %106 = arith.mulf %99, %105 : vector<8x256xf32>
    %c1_i32_41 = arith.constant 1 : i32
    %107 = tpu.dynamic_rotate %106 by %c1_i32_41 dim 1 : vector<8x256xf32>, i32 -> vector<8x256xf32>
    %108 = arith.mulf %11, %107 : vector<8x256xf32>
    %c255_i32 = arith.constant 255 : i32
    %109 = tpu.dynamic_rotate %106 by %c255_i32 dim 1 : vector<8x256xf32>, i32 -> vector<8x256xf32>
    %110 = arith.mulf %20, %109 : vector<8x256xf32>
    %111 = arith.addf %108, %110 : vector<8x256xf32>
    %c16_i32 = arith.constant 16 : i32
    %112 = tpu.dynamic_rotate %106 by %c16_i32 dim 1 : vector<8x256xf32>, i32 -> vector<8x256xf32>
    %113 = arith.mulf %29, %112 : vector<8x256xf32>
    %114 = arith.addf %111, %113 : vector<8x256xf32>
    %c240_i32 = arith.constant 240 : i32
    %115 = tpu.dynamic_rotate %106 by %c240_i32 dim 1 : vector<8x256xf32>, i32 -> vector<8x256xf32>
    %116 = arith.mulf %38, %115 : vector<8x256xf32>
    %117 = arith.addf %114, %116 : vector<8x256xf32>
    %cst_42 = arith.constant dense<0.000000e+00> : vector<8x256xf32>
    %118 = tpu.matmul %43, %117, %cst_42 {dimension_numbers = #tpu.dot_dimension_numbers<[1], [0], [0], [1], [0, 0, 1, 1], [], []>, precision = #tpu.contract_precision<fp32>} : vector<8x8xf32>, vector<8x256xf32>, vector<8x256xf32> -> vector<8x256xf32>
    %119 = arith.subf %2, %118 : vector<8x256xf32>
    %c7_i32_43 = arith.constant 7 : i32
    %120 = tpu.dynamic_rotate %119 by %c7_i32_43 dim 0 : vector<8x256xf32>, i32 -> vector<8x256xf32>
    %c1_i32_44 = arith.constant 1 : i32
    %121 = tpu.dynamic_rotate %119 by %c1_i32_44 dim 0 : vector<8x256xf32>, i32 -> vector<8x256xf32>
    %122 = vector.shape_cast %67 : vector<8x1xi1> to vector<8x1xi1>
    %123 = vector.broadcast %122 : vector<8x1xi1> to vector<8x256xi1>
    %124 = arith.select %123, %120, %121 : vector<8x256xi1>, vector<8x256xf32>
    %125 = arith.maximumf %119, %124 : vector<8x256xf32>
    %c6_i32_45 = arith.constant 6 : i32
    %126 = tpu.dynamic_rotate %125 by %c6_i32_45 dim 0 : vector<8x256xf32>, i32 -> vector<8x256xf32>
    %c2_i32_46 = arith.constant 2 : i32
    %127 = tpu.dynamic_rotate %125 by %c2_i32_46 dim 0 : vector<8x256xf32>, i32 -> vector<8x256xf32>
    %128 = vector.shape_cast %85 : vector<8x1xi1> to vector<8x1xi1>
    %129 = vector.broadcast %128 : vector<8x1xi1> to vector<8x256xi1>
    %130 = arith.select %129, %126, %127 : vector<8x256xi1>, vector<8x256xf32>
    %131 = arith.maximumf %125, %130 : vector<8x256xf32>
    %132 = arith.subf %119, %131 : vector<8x256xf32>
    %133 = math.exp %132 : vector<8x256xf32>
    %cst_47 = arith.constant dense<0.000000e+00> : vector<8x256xf32>
    %134 = tpu.matmul %48, %133, %cst_47 {dimension_numbers = #tpu.dot_dimension_numbers<[1], [0], [0], [1], [0, 0, 1, 1], [], []>, precision = #tpu.contract_precision<fp32>} : vector<8x8xf32>, vector<8x256xf32>, vector<8x256xf32> -> vector<8x256xf32>
    %135 = tpu.reciprocal %134 {approx = true} : vector<8x256xf32> -> vector<8x256xf32>
    %136 = arith.mulf %134, %135 : vector<8x256xf32>
    %cst_48 = arith.constant 2.000000e+00 : f32
    %137 = vector.broadcast %cst_48 : f32 to vector<8x256xf32>
    %138 = arith.subf %137, %136 : vector<8x256xf32>
    %139 = arith.mulf %135, %138 : vector<8x256xf32>
    %140 = arith.mulf %133, %139 : vector<8x256xf32>
    %c1_i32_49 = arith.constant 1 : i32
    %141 = tpu.dynamic_rotate %140 by %c1_i32_49 dim 1 : vector<8x256xf32>, i32 -> vector<8x256xf32>
    %142 = arith.mulf %11, %141 : vector<8x256xf32>
    %c255_i32_50 = arith.constant 255 : i32
    %143 = tpu.dynamic_rotate %140 by %c255_i32_50 dim 1 : vector<8x256xf32>, i32 -> vector<8x256xf32>
    %144 = arith.mulf %20, %143 : vector<8x256xf32>
    %145 = arith.addf %142, %144 : vector<8x256xf32>
    %c16_i32_51 = arith.constant 16 : i32
    %146 = tpu.dynamic_rotate %140 by %c16_i32_51 dim 1 : vector<8x256xf32>, i32 -> vector<8x256xf32>
    %147 = arith.mulf %29, %146 : vector<8x256xf32>
    %148 = arith.addf %145, %147 : vector<8x256xf32>
    %c240_i32_52 = arith.constant 240 : i32
    %149 = tpu.dynamic_rotate %140 by %c240_i32_52 dim 1 : vector<8x256xf32>, i32 -> vector<8x256xf32>
    %150 = arith.mulf %38, %149 : vector<8x256xf32>
    %151 = arith.addf %148, %150 : vector<8x256xf32>
    %cst_53 = arith.constant dense<0.000000e+00> : vector<8x256xf32>
    %152 = tpu.matmul %43, %151, %cst_53 {dimension_numbers = #tpu.dot_dimension_numbers<[1], [0], [0], [1], [0, 0, 1, 1], [], []>, precision = #tpu.contract_precision<fp32>} : vector<8x8xf32>, vector<8x256xf32>, vector<8x256xf32> -> vector<8x256xf32>
    %153 = arith.subf %2, %152 : vector<8x256xf32>
    %c7_i32_54 = arith.constant 7 : i32
    %154 = tpu.dynamic_rotate %153 by %c7_i32_54 dim 0 : vector<8x256xf32>, i32 -> vector<8x256xf32>
    %c1_i32_55 = arith.constant 1 : i32
    %155 = tpu.dynamic_rotate %153 by %c1_i32_55 dim 0 : vector<8x256xf32>, i32 -> vector<8x256xf32>
    %156 = vector.shape_cast %67 : vector<8x1xi1> to vector<8x1xi1>
    %157 = vector.broadcast %156 : vector<8x1xi1> to vector<8x256xi1>
    %158 = arith.select %157, %154, %155 : vector<8x256xi1>, vector<8x256xf32>
    %159 = arith.maximumf %153, %158 : vector<8x256xf32>
    %c6_i32_56 = arith.constant 6 : i32
    %160 = tpu.dynamic_rotate %159 by %c6_i32_56 dim 0 : vector<8x256xf32>, i32 -> vector<8x256xf32>
    %c2_i32_57 = arith.constant 2 : i32
    %161 = tpu.dynamic_rotate %159 by %c2_i32_57 dim 0 : vector<8x256xf32>, i32 -> vector<8x256xf32>
    %162 = vector.shape_cast %85 : vector<8x1xi1> to vector<8x1xi1>
    %163 = vector.broadcast %162 : vector<8x1xi1> to vector<8x256xi1>
    %164 = arith.select %163, %160, %161 : vector<8x256xi1>, vector<8x256xf32>
    %165 = arith.maximumf %159, %164 : vector<8x256xf32>
    %166 = arith.subf %153, %165 : vector<8x256xf32>
    %167 = math.exp %166 : vector<8x256xf32>
    %cst_58 = arith.constant dense<0.000000e+00> : vector<8x256xf32>
    %168 = tpu.matmul %48, %167, %cst_58 {dimension_numbers = #tpu.dot_dimension_numbers<[1], [0], [0], [1], [0, 0, 1, 1], [], []>, precision = #tpu.contract_precision<fp32>} : vector<8x8xf32>, vector<8x256xf32>, vector<8x256xf32> -> vector<8x256xf32>
    %169 = tpu.reciprocal %168 {approx = true} : vector<8x256xf32> -> vector<8x256xf32>
    %170 = arith.mulf %168, %169 : vector<8x256xf32>
    %cst_59 = arith.constant 2.000000e+00 : f32
    %171 = vector.broadcast %cst_59 : f32 to vector<8x256xf32>
    %172 = arith.subf %171, %170 : vector<8x256xf32>
    %173 = arith.mulf %169, %172 : vector<8x256xf32>
    %174 = arith.mulf %167, %173 : vector<8x256xf32>
    %c1_i32_60 = arith.constant 1 : i32
    %175 = tpu.dynamic_rotate %174 by %c1_i32_60 dim 1 : vector<8x256xf32>, i32 -> vector<8x256xf32>
    %176 = arith.mulf %11, %175 : vector<8x256xf32>
    %c255_i32_61 = arith.constant 255 : i32
    %177 = tpu.dynamic_rotate %174 by %c255_i32_61 dim 1 : vector<8x256xf32>, i32 -> vector<8x256xf32>
    %178 = arith.mulf %20, %177 : vector<8x256xf32>
    %179 = arith.addf %176, %178 : vector<8x256xf32>
    %c16_i32_62 = arith.constant 16 : i32
    %180 = tpu.dynamic_rotate %174 by %c16_i32_62 dim 1 : vector<8x256xf32>, i32 -> vector<8x256xf32>
    %181 = arith.mulf %29, %180 : vector<8x256xf32>
    %182 = arith.addf %179, %181 : vector<8x256xf32>
    %c240_i32_63 = arith.constant 240 : i32
    %183 = tpu.dynamic_rotate %174 by %c240_i32_63 dim 1 : vector<8x256xf32>, i32 -> vector<8x256xf32>
    %184 = arith.mulf %38, %183 : vector<8x256xf32>
    %185 = arith.addf %182, %184 : vector<8x256xf32>
    %cst_64 = arith.constant dense<0.000000e+00> : vector<8x256xf32>
    %186 = tpu.matmul %43, %185, %cst_64 {dimension_numbers = #tpu.dot_dimension_numbers<[1], [0], [0], [1], [0, 0, 1, 1], [], []>, precision = #tpu.contract_precision<fp32>} : vector<8x8xf32>, vector<8x256xf32>, vector<8x256xf32> -> vector<8x256xf32>
    %187 = arith.subf %2, %186 : vector<8x256xf32>
    %cst_65 = arith.constant 0.000000e+00 : f32
    %188 = vector.broadcast %cst_65 : f32 to vector<8x256xf32>
    %189 = arith.subf %188, %187 : vector<8x256xf32>
    %c0_66 = arith.constant 0 : index
    %c0_67 = arith.constant 0 : index
    %190 = vector.load %arg4[%c0_66, %c0_67] : memref<8x256xf32, #tpu.memory_space<vmem>>, vector<8x256xf32>
    tpu.vector_store %arg4[%c0_66, %c0_67], %189 {strides = array<i32>} : memref<8x256xf32, #tpu.memory_space<vmem>>, vector<8x256xf32>,
    return
  }
  func.func @transform_0(%arg0: i32) -> (i32, i32) {
    %c0_i32 = arith.constant 0 : i32
    %c0_i32_0 = arith.constant 0 : i32
    return %arg0, %c0_i32 : i32, i32
  }
  func.func @transform_1(%arg0: i32) -> (i32, i32, i32) {
    %c0_i32 = arith.constant 0 : i32
    %c0_i32_0 = arith.constant 0 : i32
    %c0_i32_1 = arith.constant 0 : i32
    return %arg0, %c0_i32, %c0_i32_0 : i32, i32, i32
  }
  func.func @transform_2(%arg0: i32) -> (i32, i32) {
    %c0_i32 = arith.constant 0 : i32
    %c0_i32_0 = arith.constant 0 : i32
    %c0_i32_1 = arith.constant 0 : i32
    return %c0_i32, %c0_i32_0 : i32, i32
  }
  func.func @transform_3(%arg0: i32) -> (i32, i32) {
    %c0_i32 = arith.constant 0 : i32
    %c0_i32_0 = arith.constant 0 : i32
    return %arg0, %c0_i32 : i32, i32
  }
}

</mosaic_0001>

<bundles_post_ra>
// kernel: tpu_custom_call.1
= control target key start
LH: loop header
LB: loop body
LE: loop exit
PB: predicated region body
PF: predicated region fallthrough
CT: control target
= control target key end

     0   :  { %8 = vsyncpa [#allocation3], 0  ;;  %s3784_s0 = inlined_call_operand.hbm [shape: f32[8,256], index: 0, kind: input, shape index: {}]   ;;  %s3785_s1 = inlined_call_operand.hbm [shape: f32[2,4,256], index: 1, kind: input, shape index: {}]   ;;  %s3786_s2 = inlined_call_operand.vmem [shape: f32[4,4], index: 2, kind: input, shape index: {}]   ;;  %s3787_s3 = inlined_call_operand.hbm [shape: f32[8,256], index: 3, kind: output, shape index: {}]  }
   0x1   :  { %9 = vsyncpa [#allocation6], 0 }
   0x2   :  { %10 = vsyncpa [#allocation4], 0  ;;  %s3417_s12 = smov [#allocation2]   ;;  %s3418_s14 = smov [#allocation5]  }
   0x3   :  { %s17_s13 = sshll.u32 %s3417_s12, 4  ;;  %s26_s15 = sshll.u32 %s3418_s14, 4  ;;  %s18_s13 = int_to_ptr.vmem [resolvable:$true] %s17_s13  ;;  %s3449_s15 = int_to_ptr.vmem [resolvable:$true] %s26_s15 }
   0x4   :  { %s3345_s18 = scalar_lea.hbm %s3784_s0, 256 }
   0x5   :  { %p3346_p0 = scmp.ne.s32.totalorder %s3784_s0, %s3345_s18  ;;  %p3349_p1 = scmp.lt.u32.totalorder %s3345_s18, %s3784_s0 }
   0x7   :  { %p3351_p2 = pnand %p3349_p1, %p3346_p0 }
   0x9   :  { %3354 = shalt.err (!%p3351_p2)
}
   0xa   :  { %s3355_s23 = scalar_lea.vmem %s18_s13, 256  ;;  %p3360_p4 = scmp.lt.s32.totalorder %s18_s13, %s18_s13 }
   0xb   :  { %p3356_p3 = scmp.ne.s32.totalorder %s18_s13, %s3355_s23  ;;  %p3361_p5 = scmp.lt.s32.totalorder %s3355_s23, %s3355_s23 }
   0xd   :  { %p3362_p6 = por %p3361_p5, %p3360_p4 }
   0xf   :  { %p3363_p7 = pnand %p3362_p6, %p3356_p3 }
  0x11   :  { %3366 = shalt.err (!%p3363_p7)
}
  0x12   :  { %20 = dma.hbm_to_vmem [thread:$0]  %s3784_s0, 256, %s18_s13, [#allocation3]  }
  0x13   :  { %s3367_s28 = scalar_lea.hbm %s3785_s1, 256 }
  0x14   :  { %p3368_p8 = scmp.ne.s32.totalorder %s3785_s1, %s3367_s28  ;;  %p3371_p9 = scmp.lt.u32.totalorder %s3367_s28, %s3785_s1 }
  0x16   :  { %p3373_p10 = pnand %p3371_p9, %p3368_p8 }
  0x18   :  { %3376 = shalt.err (!%p3373_p10)
}
  0x19   :  { %s3377_s6 = scalar_lea.vmem %s3449_s15, 256  ;;  %p3382_p12 = scmp.lt.s32.totalorder %s3449_s15, %s3449_s15 }
  0x1a   :  { %p3378_p11 = scmp.ne.s32.totalorder %s3449_s15, %s3377_s6  ;;  %p3383_p13 = scmp.lt.s32.totalorder %s3377_s6, %s3377_s6 }
  0x1c   :  { %p3384_p0 = por %p3383_p13, %p3382_p12 }
  0x1e   :  { %p3385_p1 = pnand %p3384_p0, %p3378_p11 }
  0x20   :  { %3388 = shalt.err (!%p3385_p1)
}
  0x21   :  { %s3419_s0 = smov 128   ;;  %s3420_s7 = smov 8  }
  0x22   :  { %32 = dma.hbm_to_vmem [thread:$0]  %s3785_s1, 256, %s3449_s15, [#allocation6], %s3419_s0, %s3419_s0, %s3420_s7  }
  0x23   :  { %3411 = dma.done.wait [#allocation3], 256  }
  0x24   :  { %3412 = vsyncadd [#allocation3], 4294967040 }
  0x25   :  { %3413 = dma.done.wait [#allocation6], 256  }
  0x26   :  { %3414 = vsyncadd [#allocation6], 4294967040  ;;  %v47_v0 = vlaneseq  ;;  %v3421_v1 = vmov 0.0   ;;  %vm158_vm0 = vcmask 31744   ;;  %v3422_v4 = vmov 1.0   ;;  %v42_v6 = vld [vmem:[#allocation2 + $0x8] sm:$0xff] }
  0x27   :  { %299 = vmatprep.mubr.f32.mxu0 %v3421_v1  ;;  %821 = vmatprep.mubr.f32.mxu1 %v3421_v1  ;;  %v170_v5 = vsel %vm158_vm0, 0.0, %v3422_v4  ;;  %v41_v7 = vld [vmem:[#allocation2] sm:$0xff]  ;;  %v3487_v8 = vsub.f32 0.0, %v42_v6  ;;  %vm70_vm1 = vcmask 1043456   ;;  %v169_v12 = vsel %vm158_vm0, 1.0, %v3421_v1  ;;  %s3423_s11 = smov 4  }
  0x28   :  { %v3483_v2 = vshrl.u32 %v47_v0, 7  ;;  %v3489_v9 = vsub.f32 0.0, %v41_v7  ;;  %v172_v13 = vrot.slane %v170_v5, 4  ;;  %vm229_vm3 = vcmask 64512   ;;  %v157_v54 = vld [vmem:[%s3786_s2] sm:$0xf] }
  0x29   :  { %v204_v14 = vrot.slane %v3487_v8, 1  ;;  %v206_v15 = vrot.slane %v3487_v8, 7  ;;  %161 = vrot.lane.b32.xlu0 %v157_v54, %s3423_s11  ;;  %s3424_s12 = smov 127   ;;  %s3425_s13 = smov 1  }
  0x2a   :  { %v181_v3 = vand.u32 1, %v3483_v2  ;;  %v194_v11 = vand.u32 3, %v3483_v2  ;;  %v203_v16 = vrot.slane %v3489_v9, 1  ;;  %v205_v17 = vrot.slane %v3489_v9, 7  ;;  %s3426_s2 = smov 16   ;;  %s3427_s14 = smov 112  }
  0x2b   :  { %v174_v22 = vsel %vm70_vm1, %v169_v12, %v172_v13  ;;  %v159_v12 = vsel %vm158_vm0, %v157_v54, 0.0  ;;  %s3428_s15 = smov [#allocation7]  }
  0x2c   :  { %vm3491_vm2 = vcmp.lt.s32.totalorder %v181_v3, 1  ;;  %vm3509_vm4 = vcmp.lt.s32.totalorder %v194_v11, 2  ;;  %v231_v28 = vsel %vm229_vm3, %v174_v22, 0  ;;  %v58_v22 = vld [vmem:[#allocation5 + $0x8] ss:$4 sm:$0x3] }
  0x2d   :  { %v210_v18 = vsel %vm3491_vm2, %v204_v14, %v206_v15  ;;  %v209_v19 = vsel %vm3491_vm2, %v203_v16, %v205_v17  ;;  %v3518_v33 = vand.u32 4294901760, %v231_v28  ;;  %v49_v15 = vsub.s32 0, %v3483_v2  ;;  %v74_v17 = vld [vmem:[#allocation5 + $0x1] ss:$4 sm:$0x3]  ;;  %s3236_s16 = sshll.u32 %s3428_s15, 4  ;;  %s3237_s16 = int_to_ptr.vmem [resolvable:$true] %s3236_s16 }
  0x2e   :  { %v212_v20 = vmax.f32 %v3487_v8, %v210_v18  ;;  %v211_v21 = vmax.f32 %v3489_v9, %v209_v19  ;;  %v53_v16 = vsub.s32 1, %v3483_v2  ;;  %v87_v19 = vld [vmem:[#allocation5 + $0x9] ss:$4 sm:$0x3]  ;;  %s3389_s17 = scalar_lea.vmem %s3237_s16, 256  ;;  %p3394_p3 = scmp.lt.s32.totalorder %s3237_s16, %s3237_s16 }
  0x2f   :  { %v3523_v38 = vsub.f32 %v231_v28, %v3518_v33  ;;  %v92_v28 = vrot.slane %v87_v19, %v49_v15  ;;  %v63_v2 = vrot.slane %v58_v22, %v49_v15  ;;  %p3390_p2 = scmp.ne.s32.totalorder %s3237_s16, %s3389_s17  ;;  %p3395_p4 = scmp.lt.s32.totalorder %s3389_s17, %s3389_s17 }
  0x30   :  { %v214_v24 = vrot.slane %v212_v20, 2  ;;  %v216_v25 = vrot.slane %v212_v20, 6  ;;  %v213_v26 = vrot.slane %v211_v21, 2  ;;  %v215_v27 = vrot.slane %v211_v21, 6 }
  0x31   :  { %v3526_v39 = vand.u32 4294901760, %v3523_v38  ;;  %p3396_p5 = por %p3395_p4, %p3394_p3 }
  0x32   :  { %v220_v29 = vsel %vm3509_vm4, %v214_v24, %v216_v25  ;;  %v219_v30 = vsel %vm3509_vm4, %v213_v26, %v215_v27  ;;  %v79_v26 = vrot.slane %v74_v17, %v49_v15  ;;  %v83_v27 = vrot.slane %v74_v17, %v53_v16 }
  0x33   :  { %v222_v31 = vmax.f32 %v212_v20, %v220_v29  ;;  %v221_v32 = vmax.f32 %v211_v21, %v219_v30  ;;  %v303_v40 = vsub.f32 %v3523_v38, %v3526_v39  ;;  %v3564_v20 = vand.u32 127, %v47_v0  ;;  %v45_v21 = vld [vmem:[#allocation5] ss:$4 sm:$0x3]  ;;  %p3397_p6 = pnand %p3396_p5, %p3390_p2 }
  0x34   :  { %v96_v29 = vrot.slane %v87_v19, %v53_v16  ;;  %v102_v30 = vld [vmem:[#allocation5 + $0x2] ss:$4 sm:$0x3]  ;;  %v130_v0 = vld [vmem:[#allocation5 + $0x3] ss:$4 sm:$0x3] }
  0x35   :  { %v224_v34 = vsub.f32 %v3487_v8, %v222_v31  ;;  %v223_v35 = vsub.f32 %v3489_v9, %v221_v32  ;;  %v3530_v44 = vand.u32 4294901760, %v303_v40  ;;  %v115_v31 = vld [vmem:[#allocation5 + $0xa] ss:$4 sm:$0x3]  ;;  %v50_v32 = vrot.slane %v45_v21, %v49_v15 }
  0x36   :  { %vm723_vm5 = vcmp.lt.s32.totalorder %v3564_v20, 127  ;;  %vm734_vm6 = vcmp.lt.s32.totalorder %v3564_v20, 16  ;;  %vm714_vm7 = vcmp.lt.s32.totalorder %v3564_v20, 1  ;;  %vm745_vm8 = vcmp.lt.s32.totalorder %v3564_v20, 112 }
  0x37   :  { %v227_v36 = vmul.f32 1.442695, %v224_v34  ;;  %v225_v37 = vmul.f32 1.442695, %v223_v35  ;;  %v54_v34 = vrot.slane %v45_v21, %v53_v16  ;;  %v67_v35 = vrot.slane %v58_v22, %v53_v16 }
  0x39   :  { %3321 = vpow2.f32 %v227_v36 }
  0x3a   :  { %3323 = vpow2.f32 %v225_v37 }
  0x43   :  { %v3322_v41 = vpop.eup %3321 }
  0x44   :  { %v3324_v42 = vpop.eup %3323  ;;  %v233_v43 = vand.u32 4294901760, %v3322_v41 }
  0x45   :  { %v235_v45 = vand.u32 4294901760, %v3324_v42 }
  0x46   :  { %234 = vmatprep.subr.mxu0 %v233_v43  ;;  %v312_v46 = vsub.f32 %v3322_v41, %v233_v43 }
  0x47   :  { %236 = vmatpush1.msra.mxu0 %v235_v45  ;;  %v318_v47 = vsub.f32 %v3324_v42, %v235_v45 }
  0x48   :  { %305 = vmatmul.mubr.f32.vlgmr.msra.gmra.mrb[0].mxu0 %v3530_v44  ;;  %v313_v48 = vand.u32 4294901760, %v312_v46 }
  0x49   :  { %v319_v49 = vand.u32 4294901760, %v318_v47  ;;  %385 = vmatprep.mubr.f32.mxu0 %v3421_v1 }
  0x4a   :  { %v314_v50 = vsub.f32 %v312_v46, %v313_v48 }
  0x4b   :  { %v320_v51 = vsub.f32 %v318_v47, %v319_v49 }
  0x4c   :  { %v315_v52 = vand.u32 4294901760, %v314_v50  ;;  %v3582_v50 = vsel %vm70_vm1, %v54_v34, %v67_v35 }
  0x4d   :  { %v321_v53 = vand.u32 4294901760, %v320_v51  ;;  %v135_v51 = vrot.slane %v130_v0, %v49_v15 }
  0x4e   :  { %316 = vmatprep.subr.mxu0 %v315_v52  ;;  %v139_v52 = vrot.slane %v130_v0, %v53_v16 }
  0x4f   :  { %322 = vmatpush1.msra.mxu0 %v321_v53 }
  0x50   :  { %387 = vmatmul.mubr.f32.vlgmr.msra.gmra.mrb[0].mxu0 %v3518_v33  ;;  %395 = vmatprep.subr.mxu0 %v312_v46  ;;  %v143_v46 = vld [vmem:[#allocation5 + $0xb] ss:$4 sm:$0x3] }
  0x51   :  { %398 = vmatpush1.msra.mxu0 %v318_v47  ;;  %461 = vmatprep.mubr.f32.mxu0 %v3421_v1  ;;  %v3571_v47 = vsel %vm70_vm1, %v79_v26, %v92_v28 }
  0x52   :  { %471 = vmatprep.subr.mxu0 %v233_v43 }
  0x58   :  { %464 = vmatmul.mubr.f32.vlgmr.msra.gmra.mrb[0].mxu0 %v3523_v38 }
  0x59   :  { %473 = vmatpush1.msra.mxu0 %v235_v45  ;;  %536 = vmatprep.mubr.f32.mxu0 %v3421_v1 }
  0x5a   :  { %549 = vmatprep.subr.mxu0 %v313_v48  ;;  %v3574_v48 = vsel %vm70_vm1, %v83_v27, %v96_v29 }
  0x60   :  { %540 = vmatmul.mubr.f32.vlgmr.msra.gmra.mrb[0].mxu0 %v3526_v39 }
  0x61   :  { %553 = vmatpush1.msra.mxu0 %v319_v49  ;;  %616 = vmatprep.mubr.f32.mxu0 %v3421_v1  ;;  %v3579_v49 = vsel %vm70_vm1, %v50_v32, %v63_v2 }
  0x62   :  { %625 = vmatprep.subr.mxu0 %v233_v43  ;;  %v120_v43 = vrot.slane %v115_v31, %v49_v15 }
  0x68   :  { %618 = vmatmul.mubr.f32.vlgmr.msra.gmra.mrb[0].mxu0 %v3518_v33 }
  0x69   :  { %627 = vmatpush1.msra.mxu0 %v235_v45  ;;  %690 = vmatprep.mubr.f32.mxu0 %v3421_v1  ;;  %v124_v45 = vrot.slane %v115_v31, %v53_v16 }
  0x70   :  { %692 = vmatmul.mubr.f32.vlgmr.msra.gmra.mrb[0].mxu0 %v3518_v33 }
  0x71   :  { %1310 = vmatprep.mubr.f32.mxu0 %v3421_v1 }
  0x9b   :  { %v162_v6 = vpop.permute.xlu0 %161 }
  0x9c   :  { %v164_v7 = vsel %vm158_vm0, 0.0, %v162_v6 }
  0x9d   :  { %v166_v11 = vrot.slane %v164_v7, 4 }
  0x9f   :  { %v168_v13 = vsel %vm70_vm1, %v159_v12, %v166_v11 }
  0xa0   :  { %v753_v14 = vsel %vm229_vm3, %v168_v13, 0 }
  0xa1   :  { %v3561_v18 = vand.u32 4294901760, %v753_v14 }
  0xa3   :  { %v3567_v36 = vsub.f32 %v753_v14, %v3561_v18 }
  0xa5   :  { %v3614_v13 = vand.u32 4294901760, %v3567_v36 }
  0xa7   :  { %v825_v31 = vsub.f32 %v3567_v36, %v3614_v13 }
  0xa9   :  { %v3626_v0 = vand.u32 4294901760, %v825_v31 }
 0x143   :  { %v693_v55 = vpop.f32.mrb[0].mxu0 }
 0x144   :  { %3325 = vrcp.f32 %v693_v55  ;;  %v695_v56 = vpop.f32.mrb[1].mxu0 }
 0x145   :  { %3327 = vrcp.f32 %v695_v56 }
 0x14e   :  { %v3326_v57 = vpop.eup %3325 }
 0x14f   :  { %v3328_v58 = vpop.eup %3327  ;;  %v700_v59 = vmul.f32 %v3326_v57, %v693_v55  ;;  %v148_v55 = vrot.slane %v143_v46, %v49_v15 }
 0x150   :  { %v701_v60 = vmul.f32 %v3328_v58, %v695_v56  ;;  %v152_v56 = vrot.slane %v143_v46, %v53_v16 }
 0x151   :  { %v702_v61 = vsub.f32 2.0, %v700_v59  ;;  %v3608_v11 = vsel %vm70_vm1, %v135_v51, %v148_v55 }
 0x152   :  { %v703_v62 = vsub.f32 2.0, %v701_v60  ;;  %v3611_v12 = vsel %vm70_vm1, %v139_v52, %v152_v56 }
 0x153   :  { %v704_v63 = vmul.f32 %v3326_v57, %v702_v61 }
 0x154   :  { %v705_v4 = vmul.f32 %v3328_v58, %v703_v62 }
 0x155   :  { %v706_v3 = vmul.f32 %v3324_v42, %v704_v63  ;;  %v111_v42 = vrot.slane %v102_v30, %v53_v16 }
 0x156   :  { %v707_v5 = vmul.f32 %v3322_v41, %v705_v4  ;;  %v107_v41 = vrot.slane %v102_v30, %v49_v15 }
 0x157   :  { %719 = vrot.lane.b32.xlu1 %v706_v3, %s3424_s12  ;;  %708 = vrot.lane.b32.xlu0 %v706_v3, %s3425_s13  ;;  %v3592_v58 = vsel %vm70_vm1, %v111_v42, %v124_v45 }
 0x158   :  { %v3589_v57 = vsel %vm70_vm1, %v107_v41, %v120_v43 }
 0x15b   :  { %730 = vrot.lane.b32.xlu1 %v706_v3, %s3426_s2  ;;  %721 = vrot.lane.b32.xlu0 %v707_v5, %s3424_s12 }
 0x15f   :  { %732 = vrot.lane.b32.xlu0 %v707_v5, %s3426_s2  ;;  %710 = vrot.lane.b32.xlu1 %v707_v5, %s3425_s13 }
 0x163   :  { %743 = vrot.lane.b32.xlu0 %v707_v5, %s3427_s14  ;;  %741 = vrot.lane.b32.xlu1 %v706_v3, %s3427_s14 }
 0x1c9   :  { %v720_v24 = vpop.permute.xlu1 %719  ;;  %v709_v25 = vpop.permute.xlu0 %708 }
 0x1cd   :  { %v731_v37 = vpop.permute.xlu1 %730  ;;  %v722_v40 = vpop.permute.xlu0 %721 }
 0x1ce   :  { %v724_v53 = vsel %vm723_vm5, %v720_v24, %v722_v40  ;;  %v725_v54 = vsel %vm723_vm5, %v722_v40, %v720_v24 }
 0x1cf   :  { %v726_v4 = vmul.f32 %v724_v53, %v3571_v47  ;;  %v727_v5 = vmul.f32 %v725_v54, %v3574_v48 }
 0x1d1   :  { %v733_v59 = vpop.permute.xlu0 %732  ;;  %v711_v60 = vpop.permute.xlu1 %710 }
 0x1d2   :  { %v735_v61 = vsel %vm734_vm6, %v731_v37, %v733_v59  ;;  %v736_v62 = vsel %vm734_vm6, %v733_v59, %v731_v37  ;;  %v715_v63 = vsel %vm714_vm7, %v709_v25, %v711_v60  ;;  %v716_v3 = vsel %vm714_vm7, %v711_v60, %v709_v25 }
 0x1d3   :  { %v717_v6 = vmul.f32 %v716_v3, %v3579_v49  ;;  %v718_v7 = vmul.f32 %v715_v63, %v3582_v50  ;;  %v737_v14 = vmul.f32 %v736_v62, %v3589_v57  ;;  %v738_v15 = vmul.f32 %v735_v61, %v3592_v58 }
 0x1d5   :  { %v728_v16 = vadd.f32 %v726_v4, %v717_v6  ;;  %v729_v17 = vadd.f32 %v727_v5, %v718_v7  ;;  %v744_v19 = vpop.permute.xlu0 %743  ;;  %v742_v21 = vpop.permute.xlu1 %741 }
 0x1d6   :  { %v746_v22 = vsel %vm745_vm8, %v742_v21, %v744_v19  ;;  %v747_v24 = vsel %vm745_vm8, %v744_v19, %v742_v21 }
 0x1d7   :  { %v739_v25 = vadd.f32 %v737_v14, %v728_v16  ;;  %v740_v26 = vadd.f32 %v738_v15, %v729_v17  ;;  %v748_v27 = vmul.f32 %v746_v22, %v3608_v11  ;;  %v749_v28 = vmul.f32 %v747_v24, %v3611_v12 }
 0x1d9   :  { %v750_v29 = vadd.f32 %v748_v27, %v739_v25  ;;  %v751_v30 = vadd.f32 %v749_v28, %v740_v26 }
 0x1db   :  { %v755_v32 = vand.u32 4294901760, %v751_v30  ;;  %v757_v34 = vand.u32 4294901760, %v750_v29 }
 0x1dd   :  { %v834_v2 = vsub.f32 %v751_v30, %v755_v32  ;;  %v840_v35 = vsub.f32 %v750_v29, %v757_v34  ;;  %756 = vmatprep.subr.mxu1 %v755_v32 }
 0x1de   :  { %758 = vmatpush1.msra.mxu1 %v757_v34 }
 0x1df   :  { %827 = vmatmul.mubr.f32.vlgmr.msra.gmra.mrb[0].mxu1 %v3626_v0  ;;  %v835_v37 = vand.u32 4294901760, %v834_v2  ;;  %v841_v40 = vand.u32 4294901760, %v840_v35 }
 0x1e0   :  { %907 = vmatprep.mubr.f32.mxu1 %v3421_v1 }
 0x1e1   :  { %v836_v41 = vsub.f32 %v834_v2, %v835_v37  ;;  %v842_v42 = vsub.f32 %v840_v35, %v841_v40 }
 0x1e3   :  { %v837_v43 = vand.u32 4294901760, %v836_v41  ;;  %v843_v45 = vand.u32 4294901760, %v842_v42 }
 0x1e5   :  { %838 = vmatprep.subr.mxu1 %v837_v43 }
 0x1e6   :  { %844 = vmatpush1.msra.mxu1 %v843_v45 }
 0x1e7   :  { %909 = vmatmul.mubr.f32.vlgmr.msra.gmra.mrb[0].mxu1 %v3561_v18  ;;  %917 = vmatprep.subr.mxu1 %v834_v2 }
 0x1e8   :  { %920 = vmatpush1.msra.mxu1 %v840_v35  ;;  %983 = vmatprep.mubr.f32.mxu1 %v3421_v1 }
 0x1e9   :  { %993 = vmatprep.subr.mxu1 %v755_v32 }
 0x1ef   :  { %986 = vmatmul.mubr.f32.vlgmr.msra.gmra.mrb[0].mxu1 %v3567_v36 }
 0x1f0   :  { %995 = vmatpush1.msra.mxu1 %v757_v34  ;;  %1058 = vmatprep.mubr.f32.mxu1 %v3421_v1 }
 0x1f1   :  { %1071 = vmatprep.subr.mxu1 %v835_v37 }
 0x1f7   :  { %1062 = vmatmul.mubr.f32.vlgmr.msra.gmra.mrb[0].mxu1 %v3614_v13 }
 0x1f8   :  { %1075 = vmatpush1.msra.mxu1 %v841_v40  ;;  %1138 = vmatprep.mubr.f32.mxu1 %v3421_v1 }
 0x1f9   :  { %1147 = vmatprep.subr.mxu1 %v755_v32 }
 0x1ff   :  { %1140 = vmatmul.mubr.f32.vlgmr.msra.gmra.mrb[0].mxu1 %v3561_v18 }
 0x200   :  { %1149 = vmatpush1.msra.mxu1 %v757_v34  ;;  %1212 = vmatprep.mubr.f32.mxu1 %v3421_v1 }
 0x207   :  { %1214 = vmatmul.mubr.f32.vlgmr.msra.gmra.mrb[0].mxu1 %v3561_v18 }
 0x208   :  { %1823 = vmatprep.mubr.f32.mxu1 %v3421_v1 }
 0x2da   :  { %v1215_v46 = vpop.f32.mrb[0].mxu1 }
 0x2db   :  { %v1220_v51 = vsub.f32 %v3489_v9, %v1215_v46  ;;  %v1217_v52 = vpop.f32.mrb[1].mxu1 }
 0x2dc   :  { %v1221_v53 = vsub.f32 %v3487_v8, %v1217_v52 }
 0x2dd   :  { %v1222_v54 = vrot.slane %v1220_v51, 1  ;;  %v1224_v55 = vrot.slane %v1220_v51, 7 }
 0x2de   :  { %v1223_v56 = vrot.slane %v1221_v53, 1  ;;  %v1225_v59 = vrot.slane %v1221_v53, 7 }
 0x2df   :  { %v1226_v60 = vsel %vm3491_vm2, %v1222_v54, %v1224_v55 }
 0x2e0   :  { %v1228_v61 = vmax.f32 %v1220_v51, %v1226_v60  ;;  %v1227_v62 = vsel %vm3491_vm2, %v1223_v56, %v1225_v59 }
 0x2e1   :  { %v1229_v63 = vmax.f32 %v1221_v53, %v1227_v62 }
 0x2e2   :  { %v1230_v3 = vrot.slane %v1228_v61, 2  ;;  %v1232_v4 = vrot.slane %v1228_v61, 6 }
 0x2e3   :  { %v1231_v5 = vrot.slane %v1229_v63, 2  ;;  %v1233_v6 = vrot.slane %v1229_v63, 6 }
 0x2e4   :  { %v1234_v7 = vsel %vm3509_vm4, %v1230_v3, %v1232_v4 }
 0x2e5   :  { %v1236_v14 = vmax.f32 %v1228_v61, %v1234_v7  ;;  %v1235_v15 = vsel %vm3509_vm4, %v1231_v5, %v1233_v6 }
 0x2e6   :  { %v1237_v16 = vmax.f32 %v1229_v63, %v1235_v15 }
 0x2e7   :  { %v1238_v17 = vsub.f32 %v1220_v51, %v1236_v14 }
 0x2e8   :  { %v1239_v19 = vsub.f32 %v1221_v53, %v1237_v16 }
 0x2e9   :  { %v1240_v21 = vmul.f32 1.442695, %v1238_v17 }
 0x2ea   :  { %v1242_v22 = vmul.f32 1.442695, %v1239_v19 }
 0x2eb   :  { %3329 = vpow2.f32 %v1240_v21 }
 0x2ec   :  { %3331 = vpow2.f32 %v1242_v22 }
 0x2f5   :  { %v3330_v24 = vpop.eup %3329 }
 0x2f6   :  { %v3332_v25 = vpop.eup %3331  ;;  %v1246_v26 = vand.u32 4294901760, %v3330_v24 }
 0x2f7   :  { %v1244_v27 = vand.u32 4294901760, %v3332_v25 }
 0x2f8   :  { %v1329_v28 = vsub.f32 %v3330_v24, %v1246_v26 }
 0x2f9   :  { %1245 = vmatprep.subr.mxu0 %v1244_v27  ;;  %v1323_v29 = vsub.f32 %v3332_v25, %v1244_v27 }
 0x2fa   :  { %1247 = vmatpush1.msra.mxu0 %v1246_v26  ;;  %v1330_v30 = vand.u32 4294901760, %v1329_v28 }
 0x2fb   :  { %1316 = vmatmul.mubr.f32.vlgmr.msra.gmra.mrb[2].mxu0 %v3530_v44  ;;  %v1324_v31 = vand.u32 4294901760, %v1323_v29 }
 0x2fc   :  { %v1331_v32 = vsub.f32 %v1329_v28, %v1330_v30  ;;  %1396 = vmatprep.mubr.f32.mxu0 %v3421_v1 }
 0x2fd   :  { %v1325_v34 = vsub.f32 %v1323_v29, %v1324_v31 }
 0x2fe   :  { %v1332_v35 = vand.u32 4294901760, %v1331_v32 }
 0x2ff   :  { %v1326_v2 = vand.u32 4294901760, %v1325_v34 }
 0x301   :  { %1327 = vmatprep.subr.mxu0 %v1326_v2 }
 0x302   :  { %1333 = vmatpush1.msra.mxu0 %v1332_v35 }
 0x303   :  { %1398 = vmatmul.mubr.f32.vlgmr.msra.gmra.mrb[2].mxu0 %v3518_v33  ;;  %1406 = vmatprep.subr.mxu0 %v1323_v29 }
 0x304   :  { %1409 = vmatpush1.msra.mxu0 %v1329_v28  ;;  %1472 = vmatprep.mubr.f32.mxu0 %v3421_v1 }
 0x305   :  { %1482 = vmatprep.subr.mxu0 %v1244_v27 }
 0x30b   :  { %1475 = vmatmul.mubr.f32.vlgmr.msra.gmra.mrb[2].mxu0 %v3523_v38 }
 0x30c   :  { %1484 = vmatpush1.msra.mxu0 %v1246_v26  ;;  %1547 = vmatprep.mubr.f32.mxu0 %v3421_v1 }
 0x30d   :  { %1560 = vmatprep.subr.mxu0 %v1324_v31 }
 0x313   :  { %1551 = vmatmul.mubr.f32.vlgmr.msra.gmra.mrb[2].mxu0 %v3526_v39 }
 0x314   :  { %1564 = vmatpush1.msra.mxu0 %v1330_v30  ;;  %1627 = vmatprep.mubr.f32.mxu0 %v3421_v1 }
 0x315   :  { %1636 = vmatprep.subr.mxu0 %v1244_v27 }
 0x31b   :  { %1629 = vmatmul.mubr.f32.vlgmr.msra.gmra.mrb[2].mxu0 %v3518_v33 }
 0x31c   :  { %1638 = vmatpush1.msra.mxu0 %v1246_v26  ;;  %1701 = vmatprep.mubr.f32.mxu0 %v3421_v1 }
 0x323   :  { %1703 = vmatmul.mubr.f32.vlgmr.msra.gmra.mrb[2].mxu0 %v3518_v33 }
 0x324   :  { %2312 = vmatprep.mubr.f32.mxu0 %v3421_v1 }
 0x3f6   :  { %v1704_v37 = vpop.f32.mrb[2].mxu0 }
 0x3f7   :  { %3333 = vrcp.f32 %v1704_v37  ;;  %v1706_v40 = vpop.f32.mrb[3].mxu0 }
 0x3f8   :  { %3335 = vrcp.f32 %v1706_v40 }
 0x401   :  { %v3334_v41 = vpop.eup %3333 }
 0x402   :  { %v3336_v42 = vpop.eup %3335  ;;  %v1711_v43 = vmul.f32 %v3334_v41, %v1704_v37 }
 0x403   :  { %v1712_v45 = vmul.f32 %v3336_v42, %v1706_v40 }
 0x404   :  { %v1713_v46 = vsub.f32 2.0, %v1711_v43 }
 0x405   :  { %v1714_v51 = vsub.f32 2.0, %v1712_v45 }
 0x406   :  { %v1715_v52 = vmul.f32 %v3334_v41, %v1713_v46 }
 0x407   :  { %v1716_v53 = vmul.f32 %v3336_v42, %v1714_v51 }
 0x408   :  { %v1717_v54 = vmul.f32 %v3330_v24, %v1715_v52 }
 0x409   :  { %v1718_v55 = vmul.f32 %v3332_v25, %v1716_v53 }
 0x40a   :  { %1719 = vrot.lane.b32.xlu1 %v1717_v54, %s3425_s13 }
 0x40b   :  { %1721 = vrot.lane.b32.xlu0 %v1718_v55, %s3425_s13 }
 0x40e   :  { %1727 = vrot.lane.b32.xlu1 %v1717_v54, %s3424_s12 }
 0x40f   :  { %1729 = vrot.lane.b32.xlu0 %v1718_v55, %s3424_s12 }
 0x412   :  { %1737 = vrot.lane.b32.xlu1 %v1717_v54, %s3426_s2 }
 0x413   :  { %1739 = vrot.lane.b32.xlu0 %v1718_v55, %s3426_s2 }
 0x416   :  { %1747 = vrot.lane.b32.xlu1 %v1717_v54, %s3427_s14 }
 0x417   :  { %1749 = vrot.lane.b32.xlu0 %v1718_v55, %s3427_s14 }
 0x47c   :  { %v1720_v56 = vpop.permute.xlu1 %1719 }
 0x47d   :  { %v1722_v59 = vpop.permute.xlu0 %1721 }
 0x47e   :  { %v1723_v3 = vsel %vm714_vm7, %v1720_v56, %v1722_v59  ;;  %v1724_v4 = vsel %vm714_vm7, %v1722_v59, %v1720_v56 }
 0x47f   :  { %v1725_v17 = vmul.f32 %v1724_v4, %v3579_v49  ;;  %v1726_v19 = vmul.f32 %v1723_v3, %v3582_v50 }
 0x480   :  { %v1728_v60 = vpop.permute.xlu1 %1727 }
 0x481   :  { %v1730_v61 = vpop.permute.xlu0 %1729 }
 0x482   :  { %v1731_v62 = vsel %vm723_vm5, %v1728_v60, %v1730_v61  ;;  %v1732_v63 = vsel %vm723_vm5, %v1730_v61, %v1728_v60 }
 0x483   :  { %v1733_v6 = vmul.f32 %v1731_v62, %v3571_v47  ;;  %v1734_v7 = vmul.f32 %v1732_v63, %v3574_v48 }
 0x484   :  { %v1738_v5 = vpop.permute.xlu1 %1737 }
 0x485   :  { %v1740_v14 = vpop.permute.xlu0 %1739  ;;  %v1735_v25 = vadd.f32 %v1733_v6, %v1725_v17  ;;  %v1736_v26 = vadd.f32 %v1734_v7, %v1726_v19 }
 0x486   :  { %v1741_v15 = vsel %vm734_vm6, %v1738_v5, %v1740_v14  ;;  %v1742_v16 = vsel %vm734_vm6, %v1740_v14, %v1738_v5 }
 0x487   :  { %v1743_v21 = vmul.f32 %v1742_v16, %v3589_v57  ;;  %v1744_v22 = vmul.f32 %v1741_v15, %v3592_v58 }
 0x488   :  { %v1748_v24 = vpop.permute.xlu1 %1747 }
 0x489   :  { %v1750_v27 = vpop.permute.xlu0 %1749  ;;  %v1745_v30 = vadd.f32 %v1743_v21, %v1735_v25  ;;  %v1746_v31 = vadd.f32 %v1744_v22, %v1736_v26 }
 0x48a   :  { %v1751_v28 = vsel %vm745_vm8, %v1748_v24, %v1750_v27  ;;  %v1752_v29 = vsel %vm745_vm8, %v1750_v27, %v1748_v24 }
 0x48b   :  { %v1753_v32 = vmul.f32 %v1751_v28, %v3608_v11  ;;  %v1754_v34 = vmul.f32 %v1752_v29, %v3611_v12 }
 0x48d   :  { %v1755_v2 = vadd.f32 %v1753_v32, %v1745_v30  ;;  %v1756_v35 = vadd.f32 %v1754_v34, %v1746_v31 }
 0x48f   :  { %v1757_v37 = vand.u32 4294901760, %v1756_v35  ;;  %v1759_v40 = vand.u32 4294901760, %v1755_v2 }
 0x491   :  { %v1836_v41 = vsub.f32 %v1756_v35, %v1757_v37  ;;  %v1842_v42 = vsub.f32 %v1755_v2, %v1759_v40  ;;  %1758 = vmatprep.subr.mxu1 %v1757_v37 }
 0x492   :  { %1760 = vmatpush1.msra.mxu1 %v1759_v40 }
 0x493   :  { %1829 = vmatmul.mubr.f32.vlgmr.msra.gmra.mrb[2].mxu1 %v3626_v0  ;;  %v1837_v43 = vand.u32 4294901760, %v1836_v41  ;;  %v1843_v45 = vand.u32 4294901760, %v1842_v42 }
 0x494   :  { %1909 = vmatprep.mubr.f32.mxu1 %v3421_v1 }
 0x495   :  { %v1838_v46 = vsub.f32 %v1836_v41, %v1837_v43  ;;  %v1844_v51 = vsub.f32 %v1842_v42, %v1843_v45 }
 0x497   :  { %v1839_v52 = vand.u32 4294901760, %v1838_v46  ;;  %v1845_v53 = vand.u32 4294901760, %v1844_v51 }
 0x499   :  { %1840 = vmatprep.subr.mxu1 %v1839_v52 }
 0x49a   :  { %1846 = vmatpush1.msra.mxu1 %v1845_v53 }
 0x49b   :  { %1911 = vmatmul.mubr.f32.vlgmr.msra.gmra.mrb[2].mxu1 %v3561_v18  ;;  %1919 = vmatprep.subr.mxu1 %v1836_v41 }
 0x49c   :  { %1922 = vmatpush1.msra.mxu1 %v1842_v42  ;;  %1985 = vmatprep.mubr.f32.mxu1 %v3421_v1 }
 0x49d   :  { %1995 = vmatprep.subr.mxu1 %v1757_v37 }
 0x4a3   :  { %1988 = vmatmul.mubr.f32.vlgmr.msra.gmra.mrb[2].mxu1 %v3567_v36 }
 0x4a4   :  { %1997 = vmatpush1.msra.mxu1 %v1759_v40  ;;  %2060 = vmatprep.mubr.f32.mxu1 %v3421_v1 }
 0x4a5   :  { %2073 = vmatprep.subr.mxu1 %v1837_v43 }
 0x4ab   :  { %2064 = vmatmul.mubr.f32.vlgmr.msra.gmra.mrb[2].mxu1 %v3614_v13 }
 0x4ac   :  { %2077 = vmatpush1.msra.mxu1 %v1843_v45  ;;  %2140 = vmatprep.mubr.f32.mxu1 %v3421_v1 }
 0x4ad   :  { %2149 = vmatprep.subr.mxu1 %v1757_v37 }
 0x4b3   :  { %2142 = vmatmul.mubr.f32.vlgmr.msra.gmra.mrb[2].mxu1 %v3561_v18 }
 0x4b4   :  { %2151 = vmatpush1.msra.mxu1 %v1759_v40  ;;  %2214 = vmatprep.mubr.f32.mxu1 %v3421_v1 }
 0x4bb   :  { %2216 = vmatmul.mubr.f32.vlgmr.msra.gmra.mrb[2].mxu1 %v3561_v18 }
 0x4bc   :  { %2825 = vmatprep.mubr.f32.mxu1 %v3421_v1 }
 0x58e   :  { %v2217_v54 = vpop.f32.mrb[2].mxu1 }
 0x58f   :  { %v2222_v55 = vsub.f32 %v3489_v9, %v2217_v54  ;;  %v2219_v56 = vpop.f32.mrb[3].mxu1 }
 0x590   :  { %v2223_v59 = vsub.f32 %v3487_v8, %v2219_v56 }
 0x591   :  { %v2224_v60 = vrot.slane %v2222_v55, 1  ;;  %v2226_v61 = vrot.slane %v2222_v55, 7 }
 0x592   :  { %v2225_v62 = vrot.slane %v2223_v59, 1  ;;  %v2227_v63 = vrot.slane %v2223_v59, 7 }
 0x593   :  { %v2228_v3 = vsel %vm3491_vm2, %v2224_v60, %v2226_v61 }
 0x594   :  { %v2230_v4 = vmax.f32 %v2222_v55, %v2228_v3  ;;  %v2229_v5 = vsel %vm3491_vm2, %v2225_v62, %v2227_v63 }
 0x595   :  { %v2231_v6 = vmax.f32 %v2223_v59, %v2229_v5 }
 0x596   :  { %v2232_v7 = vrot.slane %v2230_v4, 2  ;;  %v2234_v14 = vrot.slane %v2230_v4, 6 }
 0x597   :  { %v2233_v15 = vrot.slane %v2231_v6, 2  ;;  %v2235_v16 = vrot.slane %v2231_v6, 6 }
 0x598   :  { %v2236_v17 = vsel %vm3509_vm4, %v2232_v7, %v2234_v14 }
 0x599   :  { %v2238_v19 = vmax.f32 %v2230_v4, %v2236_v17  ;;  %v2237_v21 = vsel %vm3509_vm4, %v2233_v15, %v2235_v16 }
 0x59a   :  { %v2239_v22 = vmax.f32 %v2231_v6, %v2237_v21 }
 0x59b   :  { %v2240_v24 = vsub.f32 %v2222_v55, %v2238_v19 }
 0x59c   :  { %v2241_v25 = vsub.f32 %v2223_v59, %v2239_v22 }
 0x59d   :  { %v2242_v26 = vmul.f32 1.442695, %v2240_v24 }
 0x59e   :  { %v2244_v27 = vmul.f32 1.442695, %v2241_v25 }
 0x59f   :  { %3337 = vpow2.f32 %v2242_v26 }
 0x5a0   :  { %3339 = vpow2.f32 %v2244_v27 }
 0x5a9   :  { %v3338_v10 = vpop.eup %3337 }
 0x5aa   :  { %v3340_v28 = vpop.eup %3339  ;;  %v2248_v29 = vand.u32 4294901760, %v3338_v10 }
 0x5ab   :  { %v2246_v30 = vand.u32 4294901760, %v3340_v28 }
 0x5ac   :  { %v2331_v31 = vsub.f32 %v3338_v10, %v2248_v29 }
 0x5ad   :  { %2247 = vmatprep.subr.mxu0 %v2246_v30  ;;  %v2325_v32 = vsub.f32 %v3340_v28, %v2246_v30 }
 0x5ae   :  { %2249 = vmatpush1.msra.mxu0 %v2248_v29  ;;  %v2332_v34 = vand.u32 4294901760, %v2331_v31 }
 0x5af   :  { %2318 = vmatmul.mubr.f32.vlgmr.msra.gmra.mrb[4].mxu0 %v3530_v44  ;;  %v2326_v23 = vand.u32 4294901760, %v2325_v32 }
 0x5b0   :  { %v2333_v2 = vsub.f32 %v2331_v31, %v2332_v34  ;;  %2398 = vmatprep.mubr.f32.mxu0 %v3421_v1 }
 0x5b1   :  { %v2327_v35 = vsub.f32 %v2325_v32, %v2326_v23 }
 0x5b2   :  { %v2334_v40 = vand.u32 4294901760, %v2333_v2 }
 0x5b3   :  { %v2328_v37 = vand.u32 4294901760, %v2327_v35 }
 0x5b5   :  { %2329 = vmatprep.subr.mxu0 %v2328_v37 }
 0x5b6   :  { %2335 = vmatpush1.msra.mxu0 %v2334_v40 }
 0x5b7   :  { %2400 = vmatmul.mubr.f32.vlgmr.msra.gmra.mrb[4].mxu0 %v3518_v33  ;;  %2408 = vmatprep.subr.mxu0 %v2325_v32 }
 0x5b8   :  { %2411 = vmatpush1.msra.mxu0 %v2331_v31  ;;  %2474 = vmatprep.mubr.f32.mxu0 %v3421_v1 }
 0x5b9   :  { %2484 = vmatprep.subr.mxu0 %v2246_v30 }
 0x5bf   :  { %2477 = vmatmul.mubr.f32.vlgmr.msra.gmra.mrb[4].mxu0 %v3523_v38 }
 0x5c0   :  { %2486 = vmatpush1.msra.mxu0 %v2248_v29  ;;  %2549 = vmatprep.mubr.f32.mxu0 %v3421_v1 }
 0x5c1   :  { %2562 = vmatprep.subr.mxu0 %v2326_v23 }
 0x5c7   :  { %2553 = vmatmul.mubr.f32.vlgmr.msra.gmra.mrb[4].mxu0 %v3526_v39 }
 0x5c8   :  { %2566 = vmatpush1.msra.mxu0 %v2332_v34  ;;  %2629 = vmatprep.mubr.f32.mxu0 %v3421_v1 }
 0x5c9   :  { %2638 = vmatprep.subr.mxu0 %v2246_v30 }
 0x5cf   :  { %2631 = vmatmul.mubr.f32.vlgmr.msra.gmra.mrb[4].mxu0 %v3518_v33 }
 0x5d0   :  { %2640 = vmatpush1.msra.mxu0 %v2248_v29  ;;  %2703 = vmatprep.mubr.f32.mxu0 %v3421_v1 }
 0x5d7   :  { %2705 = vmatmul.mubr.f32.vlgmr.msra.gmra.mrb[4].mxu0 %v3518_v33 }
 0x6aa   :  { %v2706_v44 = vpop.f32.mrb[4].mxu0 }
 0x6ab   :  { %3341 = vrcp.f32 %v2706_v44  ;;  %v2708_v38 = vpop.f32.mrb[5].mxu0 }
 0x6ac   :  { %3343 = vrcp.f32 %v2708_v38 }
 0x6b5   :  { %v3342_v41 = vpop.eup %3341 }
 0x6b6   :  { %v3344_v42 = vpop.eup %3343  ;;  %v2713_v43 = vmul.f32 %v3342_v41, %v2706_v44 }
 0x6b7   :  { %v2714_v45 = vmul.f32 %v3344_v42, %v2708_v38 }
 0x6b8   :  { %v2715_v39 = vsub.f32 2.0, %v2713_v43 }
 0x6b9   :  { %v2716_v46 = vsub.f32 2.0, %v2714_v45 }
 0x6ba   :  { %v2717_v51 = vmul.f32 %v3342_v41, %v2715_v39 }
 0x6bb   :  { %v2718_v52 = vmul.f32 %v3344_v42, %v2716_v46 }
 0x6bc   :  { %v2719_v53 = vmul.f32 %v3338_v10, %v2717_v51 }
 0x6bd   :  { %v2720_v54 = vmul.f32 %v3340_v28, %v2718_v52 }
 0x6be   :  { %2721 = vrot.lane.b32.xlu1 %v2719_v53, %s3425_s13 }
 0x6bf   :  { %2723 = vrot.lane.b32.xlu0 %v2720_v54, %s3425_s13 }
 0x6c2   :  { %2729 = vrot.lane.b32.xlu1 %v2719_v53, %s3424_s12 }
 0x6c3   :  { %2731 = vrot.lane.b32.xlu0 %v2720_v54, %s3424_s12 }
 0x6c6   :  { %2739 = vrot.lane.b32.xlu1 %v2719_v53, %s3426_s2 }
 0x6c7   :  { %2741 = vrot.lane.b32.xlu0 %v2720_v54, %s3426_s2 }
 0x6ca   :  { %2749 = vrot.lane.b32.xlu1 %v2719_v53, %s3427_s14 }
 0x6cb   :  { %2751 = vrot.lane.b32.xlu0 %v2720_v54, %s3427_s14 }
 0x730   :  { %v2722_v33 = vpop.permute.xlu1 %2721 }
 0x731   :  { %v2724_v55 = vpop.permute.xlu0 %2723 }
 0x732   :  { %v2725_v62 = vsel %vm714_vm7, %v2722_v33, %v2724_v55  ;;  %v2726_v63 = vsel %vm714_vm7, %v2724_v55, %v2722_v33 }
 0x733   :  { %v2727_v15 = vmul.f32 %v2726_v63, %v3579_v49  ;;  %v2728_v16 = vmul.f32 %v2725_v62, %v3582_v50 }
 0x734   :  { %v2730_v56 = vpop.permute.xlu1 %2729 }
 0x735   :  { %v2732_v59 = vpop.permute.xlu0 %2731 }
 0x736   :  { %v2733_v60 = vsel %vm723_vm5, %v2730_v56, %v2732_v59  ;;  %v2734_v61 = vsel %vm723_vm5, %v2732_v59, %v2730_v56 }
 0x737   :  { %v2735_v4 = vmul.f32 %v2733_v60, %v3571_v47  ;;  %v2736_v5 = vmul.f32 %v2734_v61, %v3574_v48 }
 0x738   :  { %v2740_v3 = vpop.permute.xlu1 %2739 }
 0x739   :  { %v2742_v6 = vpop.permute.xlu0 %2741  ;;  %v2737_v22 = vadd.f32 %v2735_v4, %v2727_v15  ;;  %v2738_v47 = vadd.f32 %v2736_v5, %v2728_v16 }
 0x73a   :  { %v2743_v7 = vsel %vm734_vm6, %v2740_v3, %v2742_v6  ;;  %v2744_v14 = vsel %vm734_vm6, %v2742_v6, %v2740_v3 }
 0x73b   :  { %v2745_v17 = vmul.f32 %v2744_v14, %v3589_v57  ;;  %v2746_v19 = vmul.f32 %v2743_v7, %v3592_v58 }
 0x73c   :  { %v2750_v21 = vpop.permute.xlu1 %2749 }
 0x73d   :  { %v2752_v24 = vpop.permute.xlu0 %2751  ;;  %v2747_v26 = vadd.f32 %v2745_v17, %v2737_v22  ;;  %v2748_v27 = vadd.f32 %v2746_v19, %v2738_v47 }
 0x73e   :  { %v2753_v48 = vsel %vm745_vm8, %v2750_v21, %v2752_v24  ;;  %v2754_v25 = vsel %vm745_vm8, %v2752_v24, %v2750_v21 }
 0x73f   :  { %v2755_v49 = vmul.f32 %v2753_v48, %v3608_v11  ;;  %v2756_v50 = vmul.f32 %v2754_v25, %v3611_v12 }
 0x741   :  { %v2757_v10 = vadd.f32 %v2755_v49, %v2747_v26  ;;  %v2758_v57 = vadd.f32 %v2756_v50, %v2748_v27 }
 0x743   :  { %v2759_v28 = vand.u32 4294901760, %v2758_v57  ;;  %v2761_v58 = vand.u32 4294901760, %v2757_v10 }
 0x745   :  { %v2838_v29 = vsub.f32 %v2758_v57, %v2759_v28  ;;  %v2844_v30 = vsub.f32 %v2757_v10, %v2761_v58  ;;  %2760 = vmatprep.subr.mxu1 %v2759_v28 }
 0x746   :  { %2762 = vmatpush1.msra.mxu1 %v2761_v58 }
 0x747   :  { %2831 = vmatmul.mubr.f32.vlgmr.msra.gmra.mrb[4].mxu1 %v3626_v0  ;;  %v2839_v31 = vand.u32 4294901760, %v2838_v29  ;;  %v2845_v32 = vand.u32 4294901760, %v2844_v30 }
 0x748   :  { %2911 = vmatprep.mubr.f32.mxu1 %v3421_v1 }
 0x749   :  { %v2840_v20 = vsub.f32 %v2838_v29, %v2839_v31  ;;  %v2846_v34 = vsub.f32 %v2844_v30, %v2845_v32 }
 0x74b   :  { %v2841_v23 = vand.u32 4294901760, %v2840_v20  ;;  %v2847_v11 = vand.u32 4294901760, %v2846_v34 }
 0x74d   :  { %2842 = vmatprep.subr.mxu1 %v2841_v23 }
 0x74e   :  { %2848 = vmatpush1.msra.mxu1 %v2847_v11 }
 0x74f   :  { %2913 = vmatmul.mubr.f32.vlgmr.msra.gmra.mrb[4].mxu1 %v3561_v18  ;;  %2921 = vmatprep.subr.mxu1 %v2838_v29 }
 0x750   :  { %2924 = vmatpush1.msra.mxu1 %v2844_v30  ;;  %2987 = vmatprep.mubr.f32.mxu1 %v3421_v1 }
 0x751   :  { %2997 = vmatprep.subr.mxu1 %v2759_v28 }
 0x757   :  { %2990 = vmatmul.mubr.f32.vlgmr.msra.gmra.mrb[4].mxu1 %v3567_v36 }
 0x758   :  { %2999 = vmatpush1.msra.mxu1 %v2761_v58  ;;  %3062 = vmatprep.mubr.f32.mxu1 %v3421_v1 }
 0x759   :  { %3075 = vmatprep.subr.mxu1 %v2839_v31 }
 0x75f   :  { %3066 = vmatmul.mubr.f32.vlgmr.msra.gmra.mrb[4].mxu1 %v3614_v13 }
 0x760   :  { %3079 = vmatpush1.msra.mxu1 %v2845_v32  ;;  %3142 = vmatprep.mubr.f32.mxu1 %v3421_v1 }
 0x761   :  { %3151 = vmatprep.subr.mxu1 %v2759_v28 }
 0x767   :  { %3144 = vmatmul.mubr.f32.vlgmr.msra.gmra.mrb[4].mxu1 %v3561_v18 }
 0x768   :  { %3153 = vmatpush1.msra.mxu1 %v2761_v58  ;;  %3216 = vmatprep.mubr.f32.mxu1 %v3421_v1 }
 0x76f   :  { %3218 = vmatmul.mubr.f32.vlgmr.msra.gmra.mrb[4].mxu1 %v3561_v18 }
 0x842   :  { %v3219_v12 = vpop.f32.mrb[4].mxu1 }
 0x843   :  { %v3224_v36 = vsub.f32 %v3489_v9, %v3219_v12  ;;  %v3221_v0 = vpop.f32.mrb[5].mxu1 }
 0x844   :  { %v3225_v2 = vsub.f32 %v3487_v8, %v3221_v0 }
 0x845   :  { %v3226_v13 = vsub.f32 0.0, %v3224_v36 }
 0x846   :  { %v3227_v35 = vsub.f32 0.0, %v3225_v2 }
 0x847   :  { %3228 = vst [vmem:[#allocation7] sm:$0xff] %v3226_v13 }
 0x848   :  { %3229 = vst [vmem:[#allocation7 + $0x8] sm:$0xff] %v3227_v35 }
 0x849   :  { %3400 = shalt.err (!%p3397_p6)
}
 0x84a   :  { %s3401_s20 = scalar_lea.hbm %s3787_s3, 256 }
 0x84b   :  { %p3402_p7 = scmp.ne.s32.totalorder %s3787_s3, %s3401_s20  ;;  %p3405_p8 = scmp.lt.u32.totalorder %s3401_s20, %s3787_s3 }
 0x84d   :  { %p3407_p9 = pnand %p3405_p8, %p3402_p7 }
 0x84f   :  { %3410 = shalt.err (!%p3407_p9)
}
 0x850   :  { %3239 = dma.vmem_to_hbm [thread:$0]  %s3237_s16, 256, %s3787_s3, [#allocation4]  }
 0x851   :  { %3415 = dma.done.wait [#allocation4], 256  }
 0x852   :  { %3416 = vsyncadd [#allocation4], 4294967040 }
 0x853   :  { %3243 = vsyncpa [#allocation3], 1 }
 0x854   :  { %3244 = vsyncpa [#allocation6], 1 }
 0x855   :  { %3245 = vsyncpa [#allocation4], 1 }

</bundles_post_ra>
